<compile_context>
chip_gen: v7x
topology: tpu7x:2x2x1
jax: 0.10.0
libtpu: 0.0.40
codegen_flags: <defaults>
</compile_context>

<pallas_src>
import jax
import jax.numpy as jnp
from jax.experimental import pallas as pl
from jax.experimental.pallas import tpu as pltpu

LANE = 128          # lane-dense width used for all hidden activations
IN_FEATURES = 8
OUT_FEATURES = 4    # real number of Q-values


def _mlp_kernel(x_ref, w1_ref, wst_ref, bst_ref, o_ref):
    x = x_ref[...]                                                   # (TB, 8)

    h = jnp.dot(x, w1_ref[...], preferred_element_type=jnp.float32) + bst_ref[0:1, :]
    h = jnp.maximum(h, 0.0)                                          # (TB, 128)

    h = jnp.dot(h, wst_ref[0], preferred_element_type=jnp.float32) + bst_ref[1:2, :]
    h = jnp.maximum(h, 0.0)                                          # (TB, 128) (cols 64+ are 0)

    h = jnp.dot(h, wst_ref[1], preferred_element_type=jnp.float32) + bst_ref[2:3, :]
    h = jnp.maximum(h, 0.0)                                          # (TB, 128) (cols 32+ are 0)

    y = jnp.dot(h, wst_ref[2], preferred_element_type=jnp.float32) + bst_ref[3:4, :]
    o_ref[...] = y[:, :OUT_FEATURES].astype(o_ref.dtype)             # (TB, 4) narrow store


def _round_up(x, m):
    return (x + m - 1) // m * m


def _pad_to(a, rows, cols):
    r, c = a.shape
    return jnp.pad(a, ((0, rows - r), (0, cols - c)))


def pack_params(params):
    """Pack the 4 Linear layers into 3 lane-dense arrays.

    Returns:
      w1      : (8, 128)       fc1 weight (already lane-dense)
      w_stack : (3, 128, 128)  fc2/fc3/fc4 weights, zero-padded
      b_stack : (4, 128)       fc1..fc4 biases, zero-padded
    """
    (w1, b1), (w2, b2), (w3, b3), (w4, b4) = params
    w1p = _pad_to(w1, IN_FEATURES, LANE)                       # (8, 128)
    w_stack = jnp.stack([_pad_to(w2, LANE, LANE),              # cols 64+ zero
                         _pad_to(w3, LANE, LANE),              # rows 64+/cols 32+ zero
                         _pad_to(w4, LANE, LANE)], axis=0)     # rows 32+/cols 4+ zero
    b_stack = jnp.concatenate([_pad_to(b1, 1, LANE),
                               _pad_to(b2, 1, LANE),
                               _pad_to(b3, 1, LANE),
                               _pad_to(b4, 1, LANE)], axis=0)  # (4, 128)
    return (w1p, w_stack, b_stack)


def network_forward(state, packed_params, *, row_tile=1024):
    """Run the fused, lane-dense 4-layer MLP.

    state: (B, 8) float32. Returns (B, 4) float32.
    """
    w1, w_stack, b_stack = packed_params
    B, F = state.shape
    assert F == IN_FEATURES, state.shape

    # Row tile: big enough to amortize per-step overhead on large batches,
    # capped at ~half the (padded) batch so there are >= 2 grid blocks when
    # possible (lets v7x's 2 TensorCores shard the grid). Always a multiple
    # of 8 sublanes (f32).
    half = _round_up((_round_up(max(B, 1), 8) + 1) // 2, 8)
    TB = max(8, min(row_tile, half))
    pB = _round_up(B, TB)
    if pB != B:
        state = jnp.pad(state, ((0, pB - B), (0, 0)))
    n_blocks = pB // TB

    const2d = lambda i: (0, 0)          # resident weight/bias blocks
    const3d = lambda i: (0, 0, 0)

    weight_bytes = 4 * (w1.size + w_stack.size + b_stack.size)
    cost = pl.CostEstimate(
        flops=2 * pB * (IN_FEATURES * LANE + 3 * LANE * LANE),
        transcendentals=0,
        bytes_accessed=pB * (IN_FEATURES + OUT_FEATURES) * 4 + weight_bytes,
    )

    out = pl.pallas_call(
        _mlp_kernel,
        out_shape=jax.ShapeDtypeStruct((pB, OUT_FEATURES), jnp.float32),
        grid=(n_blocks,),
        in_specs=[
            pl.BlockSpec((TB, IN_FEATURES), lambda i: (i, 0)),   # state rows (streamed)
            pl.BlockSpec((IN_FEATURES, LANE), const2d),          # w1
            pl.BlockSpec((3, LANE, LANE), const3d),              # w2/w3/w4 stack
            pl.BlockSpec((4, LANE), const2d),                    # bias stack
        ],
        out_specs=pl.BlockSpec((TB, OUT_FEATURES), lambda i: (i, 0)),
        compiler_params=pltpu.CompilerParams(
            dimension_semantics=("parallel",),                   # v7x: shard batch over 2 TCs
        ),
        cost_estimate=cost,
    )(state, w1, w_stack, b_stack)

    return out[:B]


def init_params(seed=0):
    """Deterministic init mimicking PyTorch Linear's U(-1/sqrt(fan_in), +1/sqrt(fan_in))."""
    sizes = [(8, 128), (128, 64), (64, 32), (32, 4)]
    key = jax.random.PRNGKey(seed)
    params = []
    for (fan_in, fan_out) in sizes:
        key, kw, kb = jax.random.split(key, 3)
        bound = 1.0 / jnp.sqrt(jnp.float32(fan_in))
        w = jax.random.uniform(kw, (fan_in, fan_out), jnp.float32, -bound, bound)
        b = jax.random.uniform(kb, (1, fan_out), jnp.float32, -bound, bound)
        params.append((w, b))
    return params


def _reference(state, params):
    h = state
    for i, (w, b) in enumerate(params):
        h = h @ w + b
        if i < len(params) - 1:
            h = jnp.maximum(h, 0.0)
    return h


if __name__ == "__main__":
    key = jax.random.PRNGKey(0)
    params = init_params(seed=0)
    packed = pack_params(params)

    # Small batch of LunarLander states (8-dim observations).
    B = 8
    state = jax.random.normal(key, (B, IN_FEATURES), dtype=jnp.float32)

    out = network_forward(state, packed)
    out = jax.block_until_ready(out)
    ref = _reference(state, params)
    assert out.shape == (B, OUT_FEATURES), out.shape
    assert jnp.allclose(out, ref, atol=1e-5, rtol=1e-5), "mismatch vs reference (B=8)"

    # Exercise the batch grid + ragged-batch padding path (multiple grid steps).
    B2 = 260
    state2 = jax.random.normal(jax.random.PRNGKey(1), (B2, IN_FEATURES), dtype=jnp.float32)
    out2 = network_forward(state2, packed, row_tile=128)
    out2 = jax.block_until_ready(out2)
    ref2 = _reference(state2, params)
    assert out2.shape == (B2, OUT_FEATURES), out2.shape
    assert jnp.allclose(out2, ref2, atol=1e-5, rtol=1e-5), "mismatch vs reference (B=260)"

    # Larger batch with the default row_tile (>= 2 blocks so v7x uses both TCs).
    B3 = 2048
    state3 = jax.random.normal(jax.random.PRNGKey(2), (B3, IN_FEATURES), dtype=jnp.float32)
    out3 = network_forward(state3, packed)
    out3 = jax.block_until_ready(out3)
    ref3 = _reference(state3, params)
    assert out3.shape == (B3, OUT_FEATURES), out3.shape
    assert jnp.allclose(out3, ref3, atol=1e-5, rtol=1e-5), "mismatch vs reference (B=2048)"

    print("KERNEL_OK")
</pallas_src>

<mosaic_0001>
module attributes {stable_mosaic.version = 11 : i64} {
  func.func @_mlp_kernel(%arg0: i32, %arg1: memref<8x8xf32, #tpu.memory_space<vmem>>, %arg2: memref<8x128xf32, #tpu.memory_space<vmem>>, %arg3: memref<3x128x128xf32, #tpu.memory_space<vmem>>, %arg4: memref<4x128xf32, #tpu.memory_space<vmem>>, %arg5: memref<8x4xf32, #tpu.memory_space<vmem>>) attributes {dimension_semantics = [#tpu.dimension_semantics<parallel>], iteration_bounds = array<i64: 1>, scalar_prefetch = 0 : i64, scratch_operands = 0 : i64, tpu.core_type = #tpu.core_type<tc>, window_params = [{transform_indices = @transform_0, window_bounds = array<i64: 8, 8>}, {pipeline_mode = #tpu.pipeline_mode<synchronous>, transform_indices = @transform_1, window_bounds = array<i64: 8, 128>}, {pipeline_mode = #tpu.pipeline_mode<synchronous>, transform_indices = @transform_2, window_bounds = array<i64: 3, 128, 128>}, {pipeline_mode = #tpu.pipeline_mode<synchronous>, transform_indices = @transform_3, window_bounds = array<i64: 4, 128>}, {transform_indices = @transform_4, window_bounds = array<i64: 8, 4>}]} {
    %c0 = arith.constant 0 : index
    %c0_0 = arith.constant 0 : index
    %0 = vector.load %arg1[%c0, %c0_0] : memref<8x8xf32, #tpu.memory_space<vmem>>, vector<8x8xf32>
    %c0_1 = arith.constant 0 : index
    %c0_2 = arith.constant 0 : index
    %1 = vector.load %arg2[%c0_1, %c0_2] : memref<8x128xf32, #tpu.memory_space<vmem>>, vector<8x128xf32>
    %cst = arith.constant dense<0.000000e+00> : vector<8x128xf32>
    %2 = tpu.matmul %0, %1, %cst {dimension_numbers = #tpu.dot_dimension_numbers<[1], [0], [0], [1], [0, 0, 1, 1], [], []>} : vector<8x8xf32>, vector<8x128xf32>, vector<8x128xf32> -> vector<8x128xf32>
    %c0_3 = arith.constant 0 : index
    %c0_4 = arith.constant 0 : index
    %3 = vector.load %arg4[%c0_3, %c0_4] : memref<4x128xf32, #tpu.memory_space<vmem>>, vector<1x128xf32>
    %4 = vector.broadcast %3 : vector<1x128xf32> to vector<8x128xf32>
    %5 = arith.addf %2, %4 : vector<8x128xf32>
    %cst_5 = arith.constant 0.000000e+00 : f32
    %6 = vector.broadcast %cst_5 : f32 to vector<8x128xf32>
    %7 = arith.maximumf %5, %6 : vector<8x128xf32>
    %c0_6 = arith.constant 0 : index
    %c0_7 = arith.constant 0 : index
    %c0_8 = arith.constant 0 : index
    %8 = vector.load %arg3[%c0_6, %c0_7, %c0_8] : memref<3x128x128xf32, #tpu.memory_space<vmem>>, vector<1x128x128xf32>
    %9 = vector.shape_cast %8 : vector<1x128x128xf32> to vector<128x128xf32>
    %cst_9 = arith.constant dense<0.000000e+00> : vector<8x128xf32>
    %10 = tpu.matmul %7, %9, %cst_9 {dimension_numbers = #tpu.dot_dimension_numbers<[1], [0], [0], [1], [0, 0, 1, 1], [], []>} : vector<8x128xf32>, vector<128x128xf32>, vector<8x128xf32> -> vector<8x128xf32>
    %c1 = arith.constant 1 : index
    %c0_10 = arith.constant 0 : index
    %11 = vector.load %arg4[%c1, %c0_10] : memref<4x128xf32, #tpu.memory_space<vmem>>, vector<1x128xf32>
    %12 = vector.broadcast %11 : vector<1x128xf32> to vector<8x128xf32>
    %13 = arith.addf %10, %12 : vector<8x128xf32>
    %cst_11 = arith.constant 0.000000e+00 : f32
    %14 = vector.broadcast %cst_11 : f32 to vector<8x128xf32>
    %15 = arith.maximumf %13, %14 : vector<8x128xf32>
    %c1_12 = arith.constant 1 : index
    %c0_13 = arith.constant 0 : index
    %c0_14 = arith.constant 0 : index
    %16 = vector.load %arg3[%c1_12, %c0_13, %c0_14] : memref<3x128x128xf32, #tpu.memory_space<vmem>>, vector<1x128x128xf32>
    %17 = vector.shape_cast %16 : vector<1x128x128xf32> to vector<128x128xf32>
    %cst_15 = arith.constant dense<0.000000e+00> : vector<8x128xf32>
    %18 = tpu.matmul %15, %17, %cst_15 {dimension_numbers = #tpu.dot_dimension_numbers<[1], [0], [0], [1], [0, 0, 1, 1], [], []>} : vector<8x128xf32>, vector<128x128xf32>, vector<8x128xf32> -> vector<8x128xf32>
    %c2 = arith.constant 2 : index
    %c0_16 = arith.constant 0 : index
    %19 = vector.load %arg4[%c2, %c0_16] : memref<4x128xf32, #tpu.memory_space<vmem>>, vector<1x128xf32>
    %20 = vector.broadcast %19 : vector<1x128xf32> to vector<8x128xf32>
    %21 = arith.addf %18, %20 : vector<8x128xf32>
    %cst_17 = arith.constant 0.000000e+00 : f32
    %22 = vector.broadcast %cst_17 : f32 to vector<8x128xf32>
    %23 = arith.maximumf %21, %22 : vector<8x128xf32>
    %c2_18 = arith.constant 2 : index
    %c0_19 = arith.constant 0 : index
    %c0_20 = arith.constant 0 : index
    %24 = vector.load %arg3[%c2_18, %c0_19, %c0_20] : memref<3x128x128xf32, #tpu.memory_space<vmem>>, vector<1x128x128xf32>
    %25 = vector.shape_cast %24 : vector<1x128x128xf32> to vector<128x128xf32>
    %cst_21 = arith.constant dense<0.000000e+00> : vector<8x128xf32>
    %26 = tpu.matmul %23, %25, %cst_21 {dimension_numbers = #tpu.dot_dimension_numbers<[1], [0], [0], [1], [0, 0, 1, 1], [], []>} : vector<8x128xf32>, vector<128x128xf32>, vector<8x128xf32> -> vector<8x128xf32>
    %c3 = arith.constant 3 : index
    %c0_22 = arith.constant 0 : index
    %27 = vector.load %arg4[%c3, %c0_22] : memref<4x128xf32, #tpu.memory_space<vmem>>, vector<1x128xf32>
    %28 = vector.broadcast %27 : vector<1x128xf32> to vector<8x128xf32>
    %29 = arith.addf %26, %28 : vector<8x128xf32>
    %30 = vector.extract_strided_slice %29 {offsets = [0, 0], sizes = [8, 4], strides = [1, 1]} : vector<8x128xf32> to vector<8x4xf32>
    %c0_23 = arith.constant 0 : index
    %c0_24 = arith.constant 0 : index
    %31 = vector.load %arg5[%c0_23, %c0_24] : memref<8x4xf32, #tpu.memory_space<vmem>>, vector<8x4xf32>
    tpu.vector_store %arg5[%c0_23, %c0_24], %30 {strides = array<i32>} : memref<8x4xf32, #tpu.memory_space<vmem>>, vector<8x4xf32>,
    return
  }
  func.func @transform_0(%arg0: i32) -> (i32, i32) {
    %c0_i32 = arith.constant 0 : i32
    %c0_i32_0 = arith.constant 0 : i32
    return %arg0, %c0_i32 : i32, i32
  }
  func.func @transform_1(%arg0: i32) -> (i32, i32) {
    %c0_i32 = arith.constant 0 : i32
    %c0_i32_0 = arith.constant 0 : i32
    %c0_i32_1 = arith.constant 0 : i32
    return %c0_i32, %c0_i32_0 : i32, i32
  }
  func.func @transform_2(%arg0: i32) -> (i32, i32, i32) {
    %c0_i32 = arith.constant 0 : i32
    %c0_i32_0 = arith.constant 0 : i32
    %c0_i32_1 = arith.constant 0 : i32
    %c0_i32_2 = arith.constant 0 : i32
    return %c0_i32, %c0_i32_0, %c0_i32_1 : i32, i32, i32
  }
  func.func @transform_3(%arg0: i32) -> (i32, i32) {
    %c0_i32 = arith.constant 0 : i32
    %c0_i32_0 = arith.constant 0 : i32
    %c0_i32_1 = arith.constant 0 : i32
    return %c0_i32, %c0_i32_0 : i32, i32
  }
  func.func @transform_4(%arg0: i32) -> (i32, i32) {
    %c0_i32 = arith.constant 0 : i32
    %c0_i32_0 = arith.constant 0 : i32
    return %arg0, %c0_i32 : i32, i32
  }
}

</mosaic_0001>

<bundles_post_ra>
// kernel: tpu_custom_call.1
= control target key start
LH: loop header
LB: loop body
LE: loop exit
PB: predicated region body
PF: predicated region fallthrough
CT: control target
= control target key end

     0   :  { %9 = vsyncpa [#allocation3], 0  ;;  %s856_s0 = inlined_call_operand.hbm [shape: f32[8,8], index: 0, kind: input, shape index: {}]   ;;  %s857_s1 = inlined_call_operand.hbm [shape: f32[8,128], index: 1, kind: input, shape index: {}]   ;;  %s858_s2 = inlined_call_operand.hbm [shape: f32[3,128,128], index: 2, kind: input, shape index: {}]   ;;  %s859_s3 = inlined_call_operand.vmem [shape: f32[4,128], index: 3, kind: input, shape index: {}]   ;;  %s860_s4 = inlined_call_operand.vmem [shape: f32[8,4], index: 4, kind: output, shape index: {}]  }
   0x1   :  { %10 = vsyncpa [#allocation5], 0  ;;  %s739_s15 = smov [#allocation4]   ;;  %s740_s17 = smov [#allocation2]  }
   0x2   :  { %s27_s16 = sshll.u32 %s739_s15, 4  ;;  %s17_s18 = sshll.u32 %s740_s17, 4  ;;  %s28_s16 = int_to_ptr.vmem [resolvable:$true] %s27_s16  ;;  %s18_s18 = int_to_ptr.vmem [resolvable:$true] %s17_s18 }
   0x3   :  { %s669_s21 = scalar_lea.hbm %s857_s1, 128 }
   0x4   :  { %p670_p0 = scmp.ne.s32.totalorder %s857_s1, %s669_s21  ;;  %p673_p1 = scmp.lt.u32.totalorder %s669_s21, %s857_s1 }
   0x6   :  { %p675_p2 = pnand %p673_p1, %p670_p0 }
   0x8   :  { %678 = shalt.err (!%p675_p2)
}
   0x9   :  { %s679_s26 = scalar_lea.vmem %s28_s16, 128  ;;  %p684_p4 = scmp.lt.s32.totalorder %s28_s16, %s28_s16 }
   0xa   :  { %p680_p3 = scmp.ne.s32.totalorder %s28_s16, %s679_s26  ;;  %p685_p5 = scmp.lt.s32.totalorder %s679_s26, %s679_s26 }
   0xc   :  { %p686_p6 = por %p685_p5, %p684_p4 }
   0xe   :  { %p687_p7 = pnand %p686_p6, %p680_p3 }
  0x10   :  { %690 = shalt.err (!%p687_p7)
}
  0x11   :  { %30 = dma.hbm_to_vmem [thread:$0]  %s857_s1, 128, %s28_s16, [#allocation5]  }
  0x12   :  { %s691_s5 = scalar_lea.hbm %s856_s0, 128 }
  0x13   :  { %p692_p8 = scmp.ne.s32.totalorder %s856_s0, %s691_s5  ;;  %p695_p9 = scmp.lt.u32.totalorder %s691_s5, %s856_s0 }
  0x15   :  { %p697_p10 = pnand %p695_p9, %p692_p8 }
  0x17   :  { %700 = shalt.err (!%p697_p10)
}
  0x18   :  { %s701_s10 = scalar_lea.vmem %s18_s18, 128  ;;  %p706_p12 = scmp.lt.s32.totalorder %s18_s18, %s18_s18 }
  0x19   :  { %p702_p11 = scmp.ne.s32.totalorder %s18_s18, %s701_s10  ;;  %p707_p13 = scmp.lt.s32.totalorder %s701_s10, %s701_s10 }
  0x1b   :  { %p708_p0 = por %p707_p13, %p706_p12 }
  0x1d   :  { %p709_p1 = pnand %p708_p0, %p702_p11 }
  0x1f   :  { %712 = shalt.err (!%p709_p1)
}
  0x20   :  { %20 = dma.hbm_to_vmem [thread:$0]  %s856_s0, 128, %s18_s18, [#allocation3]  }
  0x21   :  { %s741_s12 = smov [#allocation6]   ;;  %s713_s16 = scalar_lea.hbm %s858_s2, 6144 }
  0x22   :  { %s36_s13 = sshll.u32 %s741_s12, 4  ;;  %p714_p2 = scmp.ne.s32.totalorder %s858_s2, %s713_s16  ;;  %s37_s13 = int_to_ptr.vmem [resolvable:$true] %s36_s13 }
  0x23   :  { %p717_p3 = scmp.lt.u32.totalorder %s713_s16, %s858_s2 }
  0x25   :  { %p719_p4 = pnand %p717_p3, %p714_p2 }
  0x27   :  { %722 = shalt.err (!%p719_p4)
}
  0x28   :  { %s723_s22 = scalar_lea.vmem %s37_s13, 6144  ;;  %p728_p6 = scmp.lt.s32.totalorder %s37_s13, %s37_s13 }
  0x29   :  { %p724_p5 = scmp.ne.s32.totalorder %s37_s13, %s723_s22  ;;  %p729_p7 = scmp.lt.s32.totalorder %s723_s22, %s723_s22 }
  0x2b   :  { %p730_p8 = por %p729_p7, %p728_p6 }
  0x2d   :  { %p731_p9 = pnand %p730_p8, %p724_p5 }
  0x2f   :  { %734 = shalt.err (!%p731_p9)
}
  0x30   :  { %s742_s0 = smov 128   ;;  %s743_s18 = smov 8  }
  0x31   :  { %42 = dma.hbm_to_vmem [thread:$0]  %s858_s2, 6144, %s37_s13, [#allocation5], %s742_s0, %s742_s0, %s743_s18  }
  0x32   :  { %735 = dma.done.wait [#allocation3], 128  }
  0x33   :  { %736 = vsyncadd [#allocation3], 4294967168 }
  0x34   :  { %737 = dma.done.wait [#allocation5], 6272  }
  0x35   :  { %738 = vsyncadd [#allocation5], 4294961024  ;;  %v744_v0 = vmov 0.0   ;;  %vm745_vm0 = vmmov 0   ;;  %v746_v1 = vmov 0.0|0.0   ;;  %vm61_vm1 = vcmask 64512  }
  0x36   :  { %479 = vmatprep.subr.mxu0 %v744_v0  ;;  %481 = vmatprep.mubr.msk.f32.mxu0 %vm745_vm0, %v744_v0  ;;  %v55_v2 = vld [vmem:[#allocation4] sm:$0xff]  ;;  %v54_v3 = vld [vmem:[#allocation2] sm:$0xff]  ;;  %v136_v4 = vld [vmem:[#allocation6] sm:$0xff]  ;;  %vm413_vm2 = vcmask 31744  }
  0x37   :  { %589 = vmatprep.subr.bf16.mxu1 %v746_v1  ;;  %516 = vmatprep.mubr.msk.f32.mxu1 %vm745_vm0, %v744_v0  ;;  %v137_v5 = vld [vmem:[#allocation6 + $0x8] sm:$0xff]  ;;  %v138_v6 = vld [vmem:[#allocation6 + $0x10] sm:$0xff]  ;;  %v139_v7 = vld [vmem:[#allocation6 + $0x18] sm:$0xff] }
  0x38   :  { %480 = vmatpush3.msra.mxu0 %v55_v2  ;;  %v590_v8 = vpack.c.bf16 %v137_v5, %v136_v4  ;;  %v593_v9 = vpack.c.bf16 %v139_v7, %v138_v6  ;;  %v140_v10 = vld [vmem:[#allocation6 + $0x20] sm:$0xff]  ;;  %v141_v11 = vld [vmem:[#allocation6 + $0x28] sm:$0xff]  ;;  %v142_v13 = vld [vmem:[#allocation6 + $0x30] sm:$0xff] }
  0x39   :  { %482 = vmatmul.mubr.msk.f32.vlgmr.msra.gmra.mrb[0].mxu0 %vm61_vm1, %v54_v3  ;;  %613 = vmatprep.subr.bf16.mxu0 %v746_v1  ;;  %v596_v12 = vpack.c.bf16 %v141_v11, %v140_v10  ;;  %v143_v14 = vld [vmem:[#allocation6 + $0x38] sm:$0xff]  ;;  %v144_v16 = vld [vmem:[#allocation6 + $0x40] sm:$0xff]  ;;  %v145_v17 = vld [vmem:[#allocation6 + $0x48] sm:$0xff] }
  0x3a   :  { %551 = vmatprep.mubr.msk.f32.mxu0 %vm745_vm0, %v744_v0  ;;  %591 = vmatpush3.bf16.msra.mxu1 %v590_v8  ;;  %v599_v15 = vpack.c.bf16 %v143_v14, %v142_v13  ;;  %v602_v18 = vpack.c.bf16 %v145_v17, %v144_v16  ;;  %v146_v19 = vld [vmem:[#allocation6 + $0x50] sm:$0xff]  ;;  %v147_v20 = vld [vmem:[#allocation6 + $0x58] sm:$0xff]  ;;  %v148_v22 = vld [vmem:[#allocation6 + $0x60] sm:$0xff] }
  0x3b   :  { %592 = vmatprep.subr.bf16.mxu1 %v746_v1  ;;  %v605_v21 = vpack.c.bf16 %v147_v20, %v146_v19  ;;  %v149_v23 = vld [vmem:[#allocation6 + $0x68] sm:$0xff]  ;;  %v150_v25 = vld [vmem:[#allocation6 + $0x70] sm:$0xff]  ;;  %v151_v26 = vld [vmem:[#allocation6 + $0x78] sm:$0xff] }
  0x3c   :  { %v608_v24 = vpack.c.bf16 %v149_v23, %v148_v22  ;;  %v611_v27 = vpack.c.bf16 %v151_v26, %v150_v25  ;;  %v229_v28 = vld [vmem:[#allocation6 + $0x80] sm:$0xff]  ;;  %v230_v29 = vld [vmem:[#allocation6 + $0x88] sm:$0xff]  ;;  %v231_v30 = vld [vmem:[#allocation6 + $0x90] sm:$0xff] }
  0x3d   :  { %v614_v31 = vpack.c.bf16 %v230_v29, %v229_v28  ;;  %v232_v32 = vld [vmem:[#allocation6 + $0x98] sm:$0xff]  ;;  %v233_v34 = vld [vmem:[#allocation6 + $0xa0] sm:$0xff]  ;;  %v234_v35 = vld [vmem:[#allocation6 + $0xa8] sm:$0xff] }
  0x3e   :  { %594 = vmatpush3.bf16.msra.mxu1 %v593_v9  ;;  %v617_v33 = vpack.c.bf16 %v232_v32, %v231_v30  ;;  %v620_v36 = vpack.c.bf16 %v234_v35, %v233_v34  ;;  %v235_v37 = vld [vmem:[#allocation6 + $0xb0] sm:$0xff]  ;;  %v236_v38 = vld [vmem:[#allocation6 + $0xb8] sm:$0xff]  ;;  %v237_v40 = vld [vmem:[#allocation6 + $0xc0] sm:$0xff] }
  0x3f   :  { %595 = vmatprep.subr.bf16.mxu1 %v746_v1  ;;  %615 = vmatpush3.bf16.msra.mxu0 %v614_v31  ;;  %v623_v39 = vpack.c.bf16 %v236_v38, %v235_v37  ;;  %v238_v41 = vld [vmem:[#allocation6 + $0xc8] sm:$0xff]  ;;  %v239_v43 = vld [vmem:[#allocation6 + $0xd0] sm:$0xff]  ;;  %v240_v44 = vld [vmem:[#allocation6 + $0xd8] sm:$0xff] }
  0x40   :  { %616 = vmatprep.subr.bf16.mxu0 %v746_v1  ;;  %v626_v42 = vpack.c.bf16 %v238_v41, %v237_v40  ;;  %v629_v45 = vpack.c.bf16 %v240_v44, %v239_v43  ;;  %v241_v46 = vld [vmem:[#allocation6 + $0xe0] sm:$0xff]  ;;  %v242_v47 = vld [vmem:[#allocation6 + $0xe8] sm:$0xff]  ;;  %v243_v54 = vld [vmem:[#allocation6 + $0xf0] sm:$0xff] }
  0x41   :  { %v632_v48 = vpack.c.bf16 %v242_v47, %v241_v46  ;;  %v421_v49 = vld [vmem:[%s859_s3] ss:$0 sm:$0xff]  ;;  %v244_v55 = vld [vmem:[#allocation6 + $0xf8] sm:$0xff]  ;;  %v322_v57 = vld [vmem:[#allocation6 + $0x100] sm:$0xff] }
  0x42   :  { %597 = vmatpush3.bf16.msra.mxu1 %v596_v12  ;;  %v635_v56 = vpack.c.bf16 %v244_v55, %v243_v54  ;;  %v323_v58 = vld [vmem:[#allocation6 + $0x108] sm:$0xff]  ;;  %v324_v59 = vld [vmem:[#allocation6 + $0x110] sm:$0xff]  ;;  %v325_v61 = vld [vmem:[#allocation6 + $0x118] sm:$0xff] }
  0x43   :  { %598 = vmatprep.subr.bf16.mxu1 %v746_v1  ;;  %618 = vmatpush3.bf16.msra.mxu0 %v617_v33  ;;  %v638_v60 = vpack.c.bf16 %v323_v58, %v322_v57  ;;  %v641_v62 = vpack.c.bf16 %v325_v61, %v324_v59  ;;  %v326_v63 = vld [vmem:[#allocation6 + $0x120] sm:$0xff]  ;;  %v327_v2 = vld [vmem:[#allocation6 + $0x128] sm:$0xff]  ;;  %v329_v4 = vld [vmem:[#allocation6 + $0x138] sm:$0xff] }
  0x44   :  { %619 = vmatprep.subr.bf16.mxu0 %v746_v1  ;;  %v644_v3 = vpack.c.bf16 %v327_v2, %v326_v63  ;;  %v330_v6 = vld [vmem:[#allocation6 + $0x140] sm:$0xff]  ;;  %v331_v7 = vld [vmem:[#allocation6 + $0x148] sm:$0xff]  ;;  %v332_v9 = vld [vmem:[#allocation6 + $0x150] sm:$0xff] }
  0x45   :  { %v650_v8 = vpack.c.bf16 %v331_v7, %v330_v6  ;;  %v333_v10 = vld [vmem:[#allocation6 + $0x158] sm:$0xff]  ;;  %v334_v12 = vld [vmem:[#allocation6 + $0x160] sm:$0xff]  ;;  %v335_v13 = vld [vmem:[#allocation6 + $0x168] sm:$0xff] }
  0x46   :  { %600 = vmatpush3.bf16.msra.mxu1 %v599_v15  ;;  %v653_v11 = vpack.c.bf16 %v333_v10, %v332_v9  ;;  %v656_v14 = vpack.c.bf16 %v335_v13, %v334_v12  ;;  %v423_v15 = vld [vmem:[%s859_s3 + $0x1] ss:$0 sm:$0xff]  ;;  %v336_v20 = vld [vmem:[#allocation6 + $0x170] sm:$0xff]  ;;  %v424_v23 = vld [vmem:[%s859_s3 + $0x2] ss:$0 sm:$0xff] }
  0x47   :  { %601 = vmatprep.subr.bf16.mxu1 %v746_v1  ;;  %621 = vmatpush3.bf16.msra.mxu0 %v620_v36 }
  0x48   :  { %622 = vmatprep.subr.bf16.mxu0 %v746_v1 }
  0x4a   :  { %603 = vmatpush3.bf16.msra.mxu1 %v602_v18 }
  0x4b   :  { %604 = vmatprep.subr.bf16.mxu1 %v746_v1  ;;  %624 = vmatpush3.bf16.msra.mxu0 %v623_v39 }
  0x4c   :  { %625 = vmatprep.subr.bf16.mxu0 %v746_v1 }
  0x4e   :  { %606 = vmatpush3.bf16.msra.mxu1 %v605_v21  ;;  %v337_v21 = vld [vmem:[#allocation6 + $0x178] sm:$0xff] }
  0x4f   :  { %607 = vmatprep.subr.bf16.mxu1 %v746_v1  ;;  %627 = vmatpush3.bf16.msra.mxu0 %v626_v42  ;;  %v659_v22 = vpack.c.bf16 %v337_v21, %v336_v20 }
  0x50   :  { %628 = vmatprep.subr.bf16.mxu0 %v746_v1 }
  0x52   :  { %609 = vmatpush3.bf16.msra.mxu1 %v608_v24 }
  0x53   :  { %610 = vmatprep.subr.bf16.mxu1 %v746_v1  ;;  %630 = vmatpush3.bf16.msra.mxu0 %v629_v45 }
  0x54   :  { %631 = vmatprep.subr.bf16.mxu0 %v746_v1 }
  0x56   :  { %612 = vmatpush3.bf16.msra.mxu1 %v611_v27  ;;  %v425_v27 = vld [vmem:[%s859_s3 + $0x3] ss:$0 sm:$0xff] }
  0x57   :  { %637 = vmatprep.subr.bf16.mxu1 %v746_v1  ;;  %633 = vmatpush3.bf16.msra.mxu0 %v632_v48 }
  0x58   :  { %634 = vmatprep.subr.bf16.mxu0 %v746_v1 }
  0x5b   :  { %636 = vmatpush3.bf16.msra.mxu0 %v635_v56 }
 0x10c   :  { %v131_v50 = vpop.f32.mrb[0].mxu0 }
 0x10d   :  { %v132_v51 = vadd.f32 %v421_v49, %v131_v50  ;;  %v483_v52 = vpop.f32.mrb[1].mxu0 }
 0x10f   :  { %v135_v53 = vmax.f32 %v132_v51, 0.0 }
 0x111   :  { %517 = vmatmul.mubr.f32.vlgmr.msra.gmra.mrb[0].mxu1 %v135_v53 }
 0x112   :  { %586 = vmatprep.mubr.msk.f32.mxu1 %vm745_vm0, %v744_v0  ;;  %639 = vmatpush3.bf16.msra.mxu1 %v638_v60  ;;  %v328_v0 = vld [vmem:[#allocation6 + $0x130] sm:$0xff] }
 0x113   :  { %640 = vmatprep.subr.bf16.mxu1 %v746_v1  ;;  %v647_v5 = vpack.c.bf16 %v329_v4, %v328_v0 }
 0x116   :  { %642 = vmatpush3.bf16.msra.mxu1 %v641_v62 }
 0x117   :  { %643 = vmatprep.subr.bf16.mxu1 %v746_v1 }
 0x11a   :  { %645 = vmatpush3.bf16.msra.mxu1 %v644_v3 }
 0x11b   :  { %646 = vmatprep.subr.bf16.mxu1 %v746_v1 }
 0x11e   :  { %648 = vmatpush3.bf16.msra.mxu1 %v647_v5 }
 0x11f   :  { %649 = vmatprep.subr.bf16.mxu1 %v746_v1 }
 0x122   :  { %651 = vmatpush3.bf16.msra.mxu1 %v650_v8 }
 0x123   :  { %652 = vmatprep.subr.bf16.mxu1 %v746_v1 }
 0x126   :  { %654 = vmatpush3.bf16.msra.mxu1 %v653_v11 }
 0x127   :  { %655 = vmatprep.subr.bf16.mxu1 %v746_v1 }
 0x12a   :  { %657 = vmatpush3.bf16.msra.mxu1 %v656_v14 }
 0x12b   :  { %658 = vmatprep.subr.bf16.mxu1 %v746_v1 }
 0x12e   :  { %660 = vmatpush3.bf16.msra.mxu1 %v659_v22 }
 0x1e4   :  { %v223_v16 = vpop.f32.mrb[0].mxu1 }
 0x1e5   :  { %v224_v17 = vadd.f32 %v423_v15, %v223_v16  ;;  %v518_v18 = vpop.f32.mrb[1].mxu1 }
 0x1e7   :  { %v227_v19 = vmax.f32 %v224_v17, 0.0 }
 0x1e9   :  { %552 = vmatmul.mubr.f32.vlgmr.msra.gmra.mrb[2].mxu0 %v227_v19 }
 0x2bc   :  { %v316_v24 = vpop.f32.mrb[2].mxu0 }
 0x2bd   :  { %v317_v25 = vadd.f32 %v424_v23, %v316_v24  ;;  %v553_v1 = vpop.f32.mrb[3].mxu0 }
 0x2bf   :  { %v320_v26 = vmax.f32 %v317_v25, 0.0 }
 0x2c1   :  { %587 = vmatmul.mubr.f32.vlgmr.msra.gmra.mrb[2].mxu1 %v320_v26 }
 0x394   :  { %v409_v28 = vpop.f32.mrb[2].mxu1 }
 0x395   :  { %v410_v29 = vadd.f32 %v425_v27, %v409_v28  ;;  %v588_v30 = vpop.f32.mrb[3].mxu1 }
 0x397   :  { %414 = vst.msk [vmem:[%s860_s4] sm:$0xff] %vm413_vm2, %v410_v29 }
 0x398   :  { %419 = vsyncpa [#allocation3], 1 }
 0x399   :  { %420 = vsyncpa [#allocation5], 1 }

</bundles_post_ra>
